<compile_context>
chip_gen: v7x
topology: tpu7x:2x2x1
jax: 0.10.0
libtpu: 0.0.40
codegen_flags: <defaults>
</compile_context>

<pallas_src>
import numpy as np

import jax
import jax.numpy as jnp
from jax.experimental import pallas as pl
from jax.experimental.pallas import tpu as pltpu

KERNEL_SIZE = 25
PAD = (KERNEL_SIZE - 1) // 2  # 12


def _round_up(a, b):
    return -(-a // b) * b


def _band_matrix(L):
    """Constant (L, L) matrix s.t. mean = x @ M reproduces the replicate-padded
    25-tap moving average.  M[j, t] = (1/25) * #{k in [-12,12] : clip(t+k) == j}."""
    idx = np.arange(L)
    M = np.zeros((L, L), dtype=np.float32)
    for k in range(-PAD, PAD + 1):
        src = np.clip(idx + k, 0, L - 1)
        np.add.at(M, (src, idx), 1.0 / KERNEL_SIZE)
    return M


def _series_decomp_kernel(x_ref, m_ref, res_ref, mean_ref):
    # x_ref  : (TB, L)  -- native layout: batch on sublanes, time on lanes
    # m_ref  : (L, L)   -- constant band matrix (resident in VMEM across the grid)
    x = x_ref[...].astype(jnp.float32)
    mean = jnp.dot(x, m_ref[...], preferred_element_type=jnp.float32)  # MXU
    mean_ref[...] = mean.astype(mean_ref.dtype)
    res_ref[...] = (x - mean).astype(res_ref.dtype)


@jax.jit
def series_decomp(x):
    """x: (B, L) float -> (res, moving_mean), both (B, L). Matches the PyTorch module."""
    B, L = x.shape
    dt = x.dtype

    M = jnp.asarray(_band_matrix(L))  # trace-time constant, f32

    # ---- batch tiling: multiple of 8 sublanes; >= 2 grid steps when batch allows ----
    Bp0 = _round_up(B, 8)
    TB = min(256, Bp0)
    if Bp0 // TB < 2 and Bp0 >= 16:
        TB = _round_up(Bp0, 16) // 2          # split so both v7x TCs get work
    Bp = _round_up(Bp0, TB)

    xb = x if Bp == B else jnp.pad(x, ((0, Bp - B), (0, 0)))

    esize = jnp.dtype(dt).itemsize
    vmem_est = (2 * L * L * 4                 # band matrix (worst case double-buffered)
                + 2 * TB * L * esize          # input tile, double-buffered
                + 4 * TB * L * esize          # two output tiles, double-buffered
                + (1 << 20))
    vmem_limit = int(min(64 * 2**20, max(32 * 2**20, vmem_est)))

    grid = (Bp // TB,)
    res, mean = pl.pallas_call(
        _series_decomp_kernel,
        out_shape=(jax.ShapeDtypeStruct((Bp, L), dt),
                   jax.ShapeDtypeStruct((Bp, L), dt)),
        grid=grid,
        in_specs=[pl.BlockSpec((TB, L), lambda i: (i, 0)),
                  pl.BlockSpec((L, L), lambda i: (0, 0))],
        out_specs=(pl.BlockSpec((TB, L), lambda i: (i, 0)),
                   pl.BlockSpec((TB, L), lambda i: (i, 0))),
        compiler_params=pltpu.CompilerParams(
            dimension_semantics=("parallel",),
            vmem_limit_bytes=vmem_limit),
    )(xb, M)

    if Bp != B:
        res = res[:B]
        mean = mean[:B]
    return res, mean


def _reference(x):
    # Pure-JAX reference with identical semantics (for verification).
    front = jnp.repeat(x[:, 0:1], PAD, axis=1)
    end = jnp.repeat(x[:, -1:], PAD, axis=1)
    xp = jnp.concatenate([front, x, end], axis=1)
    L = x.shape[1]
    windows = jnp.stack([xp[:, k:k + L] for k in range(KERNEL_SIZE)], axis=0)
    mean = windows.mean(axis=0)
    return x - mean, mean


if __name__ == "__main__":
    key = jax.random.PRNGKey(0)
    B, L = 4, 96   # batch of 4 series, sequence length 96
    x = jax.random.normal(key, (B, L), dtype=jnp.float32)

    res, moving_mean = series_decomp(x)
    res, moving_mean = jax.block_until_ready((res, moving_mean))

    res_ref, mean_ref = _reference(x)
    assert res.shape == (B, L) and moving_mean.shape == (B, L)
    assert jnp.allclose(moving_mean, mean_ref, atol=1e-5, rtol=1e-5)
    assert jnp.allclose(res, res_ref, atol=1e-5, rtol=1e-5)

    print("KERNEL_OK")
</pallas_src>

<mosaic_0001>
module attributes {stable_mosaic.version = 11 : i64} {
  func.func @_series_decomp_kernel(%arg0: i32, %arg1: memref<8x96xf32, #tpu.memory_space<vmem>>, %arg2: memref<96x96xf32, #tpu.memory_space<vmem>>, %arg3: memref<8x96xf32, #tpu.memory_space<vmem>>, %arg4: memref<8x96xf32, #tpu.memory_space<vmem>>) attributes {dimension_semantics = [#tpu.dimension_semantics<parallel>], iteration_bounds = array<i64: 1>, scalar_prefetch = 0 : i64, scratch_operands = 0 : i64, tpu.core_type = #tpu.core_type<tc>, window_params = [{transform_indices = @transform_0, window_bounds = array<i64: 8, 96>}, {pipeline_mode = #tpu.pipeline_mode<synchronous>, transform_indices = @transform_1, window_bounds = array<i64: 96, 96>}, {transform_indices = @transform_2, window_bounds = array<i64: 8, 96>}, {transform_indices = @transform_3, window_bounds = array<i64: 8, 96>}]} {
    %c0 = arith.constant 0 : index
    %c0_0 = arith.constant 0 : index
    %0 = vector.load %arg1[%c0, %c0_0] : memref<8x96xf32, #tpu.memory_space<vmem>>, vector<8x96xf32>
    %c0_1 = arith.constant 0 : index
    %c0_2 = arith.constant 0 : index
    %1 = vector.load %arg2[%c0_1, %c0_2] : memref<96x96xf32, #tpu.memory_space<vmem>>, vector<96x96xf32>
    %cst = arith.constant dense<0.000000e+00> : vector<8x96xf32>
    %2 = tpu.matmul %0, %1, %cst {dimension_numbers = #tpu.dot_dimension_numbers<[1], [0], [0], [1], [0, 0, 1, 1], [], []>} : vector<8x96xf32>, vector<96x96xf32>, vector<8x96xf32> -> vector<8x96xf32>
    %c0_3 = arith.constant 0 : index
    %c0_4 = arith.constant 0 : index
    %3 = vector.load %arg4[%c0_3, %c0_4] : memref<8x96xf32, #tpu.memory_space<vmem>>, vector<8x96xf32>
    tpu.vector_store %arg4[%c0_3, %c0_4], %2 {strides = array<i32>} : memref<8x96xf32, #tpu.memory_space<vmem>>, vector<8x96xf32>,
    %4 = arith.subf %0, %2 : vector<8x96xf32>
    %c0_5 = arith.constant 0 : index
    %c0_6 = arith.constant 0 : index
    %5 = vector.load %arg3[%c0_5, %c0_6] : memref<8x96xf32, #tpu.memory_space<vmem>>, vector<8x96xf32>
    tpu.vector_store %arg3[%c0_5, %c0_6], %4 {strides = array<i32>} : memref<8x96xf32, #tpu.memory_space<vmem>>, vector<8x96xf32>,
    return
  }
  func.func @transform_0(%arg0: i32) -> (i32, i32) {
    %c0_i32 = arith.constant 0 : i32
    %c0_i32_0 = arith.constant 0 : i32
    return %arg0, %c0_i32 : i32, i32
  }
  func.func @transform_1(%arg0: i32) -> (i32, i32) {
    %c0_i32 = arith.constant 0 : i32
    %c0_i32_0 = arith.constant 0 : i32
    %c0_i32_1 = arith.constant 0 : i32
    return %c0_i32, %c0_i32_0 : i32, i32
  }
  func.func @transform_2(%arg0: i32) -> (i32, i32) {
    %c0_i32 = arith.constant 0 : i32
    %c0_i32_0 = arith.constant 0 : i32
    return %arg0, %c0_i32 : i32, i32
  }
  func.func @transform_3(%arg0: i32) -> (i32, i32) {
    %c0_i32 = arith.constant 0 : i32
    %c0_i32_0 = arith.constant 0 : i32
    return %arg0, %c0_i32 : i32, i32
  }
}

</mosaic_0001>

<bundles_post_ra>
// kernel: series_decomp.1
= control target key start
LH: loop header
LB: loop body
LE: loop exit
PB: predicated region body
PF: predicated region fallthrough
CT: control target
= control target key end

     0   :  { %9 = vsyncpa [#allocation3], 0  ;;  %s215_s12 = smov [#allocation2]   ;;  %s262_s0 = inlined_call_operand.vmem [shape: f32[8,96], index: 0, kind: input, shape index: {}]   ;;  %s263_s1 = inlined_call_operand.hbm [shape: f32[96,96], index: 1, kind: input, shape index: {}]   ;;  %s264_s2 = inlined_call_operand.vmem [shape: f32[8,96], index: 2, kind: output, shape index: {0}]   ;;  %s265_s3 = inlined_call_operand.vmem [shape: f32[8,96], index: 3, kind: output, shape index: {1}]  }
   0x1   :  { %s17_s13 = sshll.u32 %s215_s12, 4  ;;  %s191_s16 = scalar_lea.hbm %s263_s1, 1536  ;;  %s18_s13 = int_to_ptr.vmem [resolvable:$true] %s17_s13 }
   0x2   :  { %p192_p0 = scmp.ne.s32.totalorder %s263_s1, %s191_s16  ;;  %p195_p1 = scmp.lt.u32.totalorder %s191_s16, %s263_s1 }
   0x4   :  { %p197_p2 = pnand %p195_p1, %p192_p0 }
   0x6   :  { %200 = shalt.err (!%p197_p2)
}
   0x7   :  { %s201_s21 = scalar_lea.vmem %s18_s13, 1536  ;;  %p206_p4 = scmp.lt.s32.totalorder %s18_s13, %s18_s13 }
   0x8   :  { %p202_p3 = scmp.ne.s32.totalorder %s18_s13, %s201_s21  ;;  %p207_p5 = scmp.lt.s32.totalorder %s201_s21, %s201_s21 }
   0xa   :  { %p208_p6 = por %p207_p5, %p206_p4 }
   0xc   :  { %p209_p7 = pnand %p208_p6, %p202_p3 }
   0xe   :  { %212 = shalt.err (!%p209_p7)
}
   0xf   :  { %s216_s22 = smov 128   ;;  %s217_s23 = smov 8  }
  0x10   :  { %23 = dma.hbm_to_vmem [thread:$0]  %s263_s1, 1536, %s18_s13, [#allocation3], %s216_s22, %s216_s22, %s217_s23  }
  0x11   :  { %213 = dma.done.wait [#allocation3], 1536  }
  0x12   :  { %214 = vsyncadd [#allocation3], 4294965760  ;;  %v218_v0 = vmov 0.0|0.0   ;;  %vm219_vm0 = vmmov 0   ;;  %v220_v1 = vmov 0.0   ;;  %v28_v2 = vld [vmem:[#allocation2] sm:$0xff] }
  0x13   :  { %167 = vmatprep.subr.bf16.mxu0 %v218_v0  ;;  %164 = vmatprep.mubr.msk.f32.mxu0 %vm219_vm0, %v220_v1  ;;  %v29_v3 = vld [vmem:[#allocation2 + $0x8] sm:$0xff]  ;;  %v30_v4 = vld [vmem:[#allocation2 + $0x10] sm:$0xff]  ;;  %v31_v6 = vld [vmem:[#allocation2 + $0x18] sm:$0xff]  ;;  %vm40_vm1 = vcmask 785408  }
  0x14   :  { %v168_v5 = vpack.c.bf16 %v29_v3, %v28_v2  ;;  %v171_v7 = vpack.c.bf16 %v31_v6, %v30_v4  ;;  %v32_v8 = vld [vmem:[#allocation2 + $0x20] sm:$0xff]  ;;  %v33_v9 = vld [vmem:[#allocation2 + $0x28] sm:$0xff]  ;;  %v34_v11 = vld [vmem:[#allocation2 + $0x30] sm:$0xff] }
  0x15   :  { %v174_v10 = vpack.c.bf16 %v33_v9, %v32_v8  ;;  %v35_v12 = vld [vmem:[#allocation2 + $0x38] sm:$0xff]  ;;  %v36_v14 = vld [vmem:[#allocation2 + $0x40] sm:$0xff]  ;;  %v37_v15 = vld [vmem:[#allocation2 + $0x48] sm:$0xff] }
  0x16   :  { %169 = vmatpush3.bf16.msra.mxu0 %v168_v5  ;;  %v177_v13 = vpack.c.bf16 %v35_v12, %v34_v11  ;;  %v180_v16 = vpack.c.bf16 %v37_v15, %v36_v14  ;;  %v38_v17 = vld [vmem:[#allocation2 + $0x50] sm:$0xff]  ;;  %v39_v18 = vld [vmem:[#allocation2 + $0x58] sm:$0xff] }
  0x17   :  { %170 = vmatprep.subr.bf16.mxu0 %v218_v0  ;;  %v183_v19 = vpack.c.bf16 %v39_v18, %v38_v17  ;;  %v27_v20 = vld [vmem:[%s262_s0] sm:$0xff] }
  0x1a   :  { %172 = vmatpush3.bf16.msra.mxu0 %v171_v7 }
  0x1b   :  { %173 = vmatprep.subr.bf16.mxu0 %v218_v0 }
  0x1e   :  { %175 = vmatpush3.bf16.msra.mxu0 %v174_v10 }
  0x1f   :  { %176 = vmatprep.subr.bf16.mxu0 %v218_v0 }
  0x22   :  { %178 = vmatpush3.bf16.msra.mxu0 %v177_v13 }
  0x23   :  { %179 = vmatprep.subr.bf16.mxu0 %v218_v0 }
  0x26   :  { %181 = vmatpush3.bf16.msra.mxu0 %v180_v16 }
  0x27   :  { %182 = vmatprep.subr.bf16.mxu0 %v218_v0 }
  0x2a   :  { %184 = vmatpush3.bf16.msra.mxu0 %v183_v19 }
  0x2d   :  { %165 = vmatmul.mubr.msk.f32.vlgmr.msra.gmra.mrb[0].mxu0 %vm40_vm1, %v27_v20 }
 0x100   :  { %v110_v21 = vpop.f32.mrb[0].mxu0 }
 0x101   :  { %114 = vst.msk [vmem:[%s265_s3] sm:$0xff] %vm40_vm1, %v110_v21  ;;  %v115_v22 = vsub.f32 %v27_v20, %v110_v21  ;;  %v166_v23 = vpop.f32.mrb[1].mxu0 }
 0x103   :  { %116 = vst.msk [vmem:[%s264_s2] sm:$0xff] %vm40_vm1, %v115_v22 }
 0x104   :  { %125 = vsyncpa [#allocation3], 1 }

</bundles_post_ra>
